<compile_context>
chip_gen: v7x
topology: tpu7x:2x2x1
jax: 0.10.0
libtpu: 0.0.40
codegen_flags: <defaults>
</compile_context>

<pallas_src>
import jax
import jax.numpy as jnp
from jax.experimental import pallas as pl
from jax.experimental.pallas import tpu as pltpu

EPS = 1e-5


# ---------------------------------------------------------------------------
# In-kernel helpers
# ---------------------------------------------------------------------------
def _bn_train_lanes(acc, gamma_l, beta_l, count, c, w_groups):
    """Training-mode BatchNorm on an (M, w_groups*c) lane-interleaved slab.

    Lane l holds channel (l % c).  One traversal accumulates sum and
    sum-of-squares; the cross-group reduction over the W lane-groups is a
    cyclic lane-roll tree which leaves the per-channel totals broadcast to
    every lane, so normalisation is a single scale+shift FMA (rsqrt -> EUP).
    """
    s1 = jnp.sum(acc, axis=0, keepdims=True)          # (1, L)
    s2 = jnp.sum(acc * acc, axis=0, keepdims=True)    # (1, L)
    shift = c
    total = c * w_groups
    while shift < total:                               # unrolled at trace time
        s1 = s1 + pltpu.roll(s1, shift, axis=1)
        s2 = s2 + pltpu.roll(s2, shift, axis=1)
        shift *= 2
    inv = 1.0 / count
    mean = s1 * inv
    var = s2 * inv - mean * mean                       # biased variance
    scale = gamma_l * jax.lax.rsqrt(var + EPS)
    return acc * scale + (beta_l - mean * scale)


def _make_kernel(N, H, W, Cin, Cmid, Cout):
    M = N * H
    count = float(N * H * W)
    Lmid = W * Cmid
    Lout = W * Cout

    def kernel(x_ref, w1b_ref, w2b_ref, bn_ref, out_ref, xpad, hpad):
        # ---- pad input along H in VMEM (W-padding is folded into the bands)
        zx = jnp.zeros((N, 1, W * Cin), jnp.float32)
        xpad[:, 0:1, :] = zx
        xpad[:, H + 1:H + 2, :] = zx
        xpad[:, 1:H + 1, :] = x_ref[...]

        # ---- conv1 (3x3, pad=1) + fused 1x1 shortcut: 3 banded matmuls ----
        acc1 = None
        for dy in range(3):
            win = xpad[:, dy:dy + H, :].reshape(M, W * Cin)
            contrib = jnp.dot(win, w1b_ref[dy],
                              preferred_element_type=jnp.float32)
            acc1 = contrib if acc1 is None else acc1 + contrib  # (M, Lmid+Lout)

        # ---- bn1 + relu on the conv1 half, bn_sc on the shortcut half ----
        h1 = _bn_train_lanes(acc1[:, :Lmid], bn_ref[0:1, :], bn_ref[1:2, :],
                             count, Cmid, W)
        h1 = jnp.maximum(h1, 0.0)
        sc = _bn_train_lanes(acc1[:, Lmid:], bn_ref[2:3, :], bn_ref[3:4, :],
                             count, Cout, W)

        # ---- re-pad the intermediate along H for conv2 ----
        zh = jnp.zeros((N, 1, Lmid), jnp.float32)
        hpad[:, 0:1, :] = zh
        hpad[:, H + 1:H + 2, :] = zh
        hpad[:, 1:H + 1, :] = h1.reshape(N, H, Lmid)

        # ---- conv2 (3x3, pad=1): 3 banded matmuls ----
        acc2 = None
        for dy in range(3):
            win = hpad[:, dy:dy + H, :].reshape(M, Lmid)
            contrib = jnp.dot(win, w2b_ref[dy],
                              preferred_element_type=jnp.float32)
            acc2 = contrib if acc2 is None else acc2 + contrib   # (M, Lout)

        h2 = _bn_train_lanes(acc2, bn_ref[4:5, :], bn_ref[5:6, :],
                             count, Cout, W)

        # ---- residual add + relu; (N*H, W*Cout) is fully lane-dense ----
        out_ref[...] = jnp.maximum(h2 + sc, 0.0)

    return kernel


# ---------------------------------------------------------------------------
# One-time weight preparation (host/XLA side, activation-independent)
# ---------------------------------------------------------------------------
def _band_from_taps(taps_dx, W):
    """taps_dx: (3, Cin, Cout) — the dx taps of one 3x3 kernel row.

    Returns the (W*Cin, W*Cout) block-banded matrix applying those taps along
    the width dimension with zero padding=1 folded in (out-of-range taps
    simply have no entry)."""
    _, Cin, Cout = taps_dx.shape
    Bpad = jnp.zeros((W + 2, Cin, W, Cout), jnp.float32)
    w = jnp.arange(W)
    for dx in range(3):
        Bpad = Bpad.at[w + dx, :, w, :].set(taps_dx[dx])
    return Bpad[1:W + 1].reshape(W * Cin, W * Cout)


def prepare_block_params(params, W):
    """Fold conv weights into per-row banded matmul weights and pre-tile the
    BatchNorm affine params to the lane-interleaved layout."""
    w1, w2, wsc, g1, b1, g2, b2, gsc, bsc = params
    Cin, Cmid = w1.shape[2], w1.shape[3]
    Cout = w2.shape[3]
    assert Cmid == Cout                      # BasicBlock, expansion == 1
    assert W & (W - 1) == 0, "W must be a power of two for the lane-roll BN"

    zsc = jnp.zeros_like(wsc)
    sc_band = _band_from_taps(jnp.stack([zsc, wsc, zsc]), W)   # (W*Cin, W*Cout)
    no_sc = jnp.zeros_like(sc_band)

    # conv1 band per dy, with the 1x1 shortcut fused as extra output columns
    # on the centre (dy == 1) band.
    w1b = jnp.stack([
        jnp.concatenate(
            [_band_from_taps(w1[dy], W), sc_band if dy == 1 else no_sc],
            axis=1)
        for dy in range(3)])                                   # (3, W*Cin, 2*W*Cmid)
    w2b = jnp.stack([_band_from_taps(w2[dy], W) for dy in range(3)])  # (3, W*Cmid, W*Cout)

    def lanes(v):                       # lane l -> v[l % C]
        return jnp.tile(v.reshape(-1), W)

    bn = jnp.stack([lanes(g1), lanes(b1),       # bn1
                    lanes(gsc), lanes(bsc),     # shortcut bn
                    lanes(g2), lanes(b2)])      # bn2       -> (6, W*Cout)
    return w1b, w2b, bn


# ---------------------------------------------------------------------------
# Pallas wrapper
# ---------------------------------------------------------------------------
def basic_block_pallas(x_nchw, prepared):
    # TODO(synk): stride != 1 downsampling not implemented in-kernel; this
    # reproduces BasicBlock(in_planes=4, planes=8, stride=1), which still
    # exercises the 1x1-conv + BN shortcut path (in_planes != planes).
    w1b, w2b, bn = prepared
    N, Cin, H, W = x_nchw.shape
    Cmid = w2b.shape[1] // W
    Cout = w2b.shape[2] // W

    # NCHW -> (N, H, W*Cin) lane-flattened NHWC.  These boundary reshapes /
    # transposes touch only a few KiB here; at real shapes they would be
    # absorbed by the surrounding network's layout.
    x_flat = (jnp.transpose(x_nchw, (0, 2, 3, 1))
              .astype(jnp.float32)
              .reshape(N, H, W * Cin))

    vmem = pl.BlockSpec(memory_space=pltpu.MemorySpace.VMEM)
    kernel = _make_kernel(N, H, W, Cin, Cmid, Cout)
    out2d = pl.pallas_call(
        kernel,
        out_shape=jax.ShapeDtypeStruct((N * H, W * Cout), jnp.float32),
        in_specs=[vmem] * 4,
        out_specs=vmem,
        scratch_shapes=[
            pltpu.VMEM((N, H + 2, W * Cin), jnp.float32),    # H-padded input
            pltpu.VMEM((N, H + 2, W * Cmid), jnp.float32),   # H-padded conv1 act
        ],
    )(x_flat, w1b, w2b, bn)

    # (N*H, W*Cout) -> (N, H, W, Cout) -> NCHW
    return jnp.transpose(out2d.reshape(N, H, W, Cout), (0, 3, 1, 2))


# ---------------------------------------------------------------------------
# Pure-JAX reference (matches PyTorch forward with training-mode BN)
# ---------------------------------------------------------------------------
def reference_forward(x_nchw, params):
    w1, w2, wsc, g1, b1, g2, b2, gsc, bsc = params
    x = jnp.transpose(x_nchw, (0, 2, 3, 1)).astype(jnp.float32)

    def conv(v, w):
        return jax.lax.conv_general_dilated(
            v, w, (1, 1), 'SAME', dimension_numbers=('NHWC', 'HWIO', 'NHWC'))

    def bn(v, g, b):
        mean = jnp.mean(v, axis=(0, 1, 2), keepdims=True)
        var = jnp.mean((v - mean) ** 2, axis=(0, 1, 2), keepdims=True)
        return ((v - mean) * jax.lax.rsqrt(var + EPS) * g.reshape(1, 1, 1, -1)
                + b.reshape(1, 1, 1, -1))

    h = jax.nn.relu(bn(conv(x, w1), g1, b1))
    h = bn(conv(h, w2), g2, b2)
    s = bn(conv(x, wsc[None, None, :, :]), gsc, bsc)
    out = jax.nn.relu(h + s)
    return jnp.transpose(out, (0, 3, 1, 2))


def init_params(key, in_planes, planes):
    k1, k2, k3 = jax.random.split(key, 3)
    w1 = jax.random.normal(k1, (3, 3, in_planes, planes), jnp.float32) * 0.1  # HWIO
    w2 = jax.random.normal(k2, (3, 3, planes, planes), jnp.float32) * 0.1
    wsc = jax.random.normal(k3, (in_planes, planes), jnp.float32) * 0.1       # 1x1 conv
    # BatchNorm2d default init: weight=1, bias=0
    g1, b1 = jnp.ones((1, planes)), jnp.zeros((1, planes))
    g2, b2 = jnp.ones((1, planes)), jnp.zeros((1, planes))
    gsc, bsc = jnp.ones((1, planes)), jnp.zeros((1, planes))
    return (w1, w2, wsc, g1, b1, g2, b2, gsc, bsc)


if __name__ == "__main__":
    key = jax.random.PRNGKey(0)
    kx, kp = jax.random.split(key)

    N, Cin, H, W = 2, 4, 16, 16
    planes = 8  # in_planes != planes -> shortcut (1x1 conv + BN) is active

    x = jax.random.normal(kx, (N, Cin, H, W), jnp.float32)   # NCHW, like PyTorch
    params = init_params(kp, Cin, planes)

    prepared = prepare_block_params(params, W)               # one-time weight prep
    out = jax.block_until_ready(basic_block_pallas(x, prepared))
    ref = jax.block_until_ready(reference_forward(x, params))

    assert out.shape == (N, planes, H, W), out.shape
    assert jnp.allclose(out, ref, atol=1e-4, rtol=1e-4), \
        float(jnp.max(jnp.abs(out - ref)))
    print("KERNEL_OK")
</pallas_src>

<mosaic_0001>
module attributes {stable_mosaic.version = 11 : i64} {
  func.func @kernel(%arg0: memref<2x16x64xf32, #tpu.memory_space<vmem>>, %arg1: memref<3x64x256xf32, #tpu.memory_space<vmem>>, %arg2: memref<3x128x128xf32, #tpu.memory_space<vmem>>, %arg3: memref<6x128xf32, #tpu.memory_space<vmem>>, %arg4: memref<32x128xf32, #tpu.memory_space<vmem>>, %arg5: memref<2x18x64xf32, #tpu.memory_space<vmem>>, %arg6: memref<2x18x128xf32, #tpu.memory_space<vmem>>) attributes {dimension_semantics = [], scalar_prefetch = 0 : i64, scratch_operands = 2 : i64, tpu.core_type = #tpu.core_type<tc>} {
    %cst = arith.constant 0.000000e+00 : f32
    %0 = vector.broadcast %cst : f32 to vector<2x1x64xf32>
    %c0 = arith.constant 0 : index
    %c0_0 = arith.constant 0 : index
    %c0_1 = arith.constant 0 : index
    %1 = vector.load %arg5[%c0, %c0_0, %c0_1] : memref<2x18x64xf32, #tpu.memory_space<vmem>>, vector<2x1x64xf32>
    tpu.vector_store %arg5[%c0, %c0_0, %c0_1], %0 {strides = array<i32>} : memref<2x18x64xf32, #tpu.memory_space<vmem>>, vector<2x1x64xf32>,
    %c0_2 = arith.constant 0 : index
    %c17 = arith.constant 17 : index
    %c0_3 = arith.constant 0 : index
    %2 = vector.load %arg5[%c0_2, %c17, %c0_3] : memref<2x18x64xf32, #tpu.memory_space<vmem>>, vector<2x1x64xf32>
    tpu.vector_store %arg5[%c0_2, %c17, %c0_3], %0 {strides = array<i32>} : memref<2x18x64xf32, #tpu.memory_space<vmem>>, vector<2x1x64xf32>,
    %c0_4 = arith.constant 0 : index
    %c0_5 = arith.constant 0 : index
    %c0_6 = arith.constant 0 : index
    %3 = vector.load %arg0[%c0_4, %c0_5, %c0_6] : memref<2x16x64xf32, #tpu.memory_space<vmem>>, vector<2x16x64xf32>
    %c0_7 = arith.constant 0 : index
    %c1 = arith.constant 1 : index
    %c0_8 = arith.constant 0 : index
    %4 = vector.load %arg5[%c0_7, %c1, %c0_8] : memref<2x18x64xf32, #tpu.memory_space<vmem>>, vector<2x16x64xf32>
    tpu.vector_store %arg5[%c0_7, %c1, %c0_8], %3 {strides = array<i32>} : memref<2x18x64xf32, #tpu.memory_space<vmem>>, vector<2x16x64xf32>,
    %c0_9 = arith.constant 0 : index
    %c0_10 = arith.constant 0 : index
    %c0_11 = arith.constant 0 : index
    %5 = vector.load %arg5[%c0_9, %c0_10, %c0_11] : memref<2x18x64xf32, #tpu.memory_space<vmem>>, vector<2x16x64xf32>
    %6 = vector.shape_cast %5 : vector<2x16x64xf32> to vector<32x64xf32>
    %c0_12 = arith.constant 0 : index
    %c0_13 = arith.constant 0 : index
    %c0_14 = arith.constant 0 : index
    %7 = vector.load %arg1[%c0_12, %c0_13, %c0_14] : memref<3x64x256xf32, #tpu.memory_space<vmem>>, vector<1x64x256xf32>
    %8 = vector.shape_cast %7 : vector<1x64x256xf32> to vector<64x256xf32>
    %cst_15 = arith.constant dense<0.000000e+00> : vector<32x256xf32>
    %9 = tpu.matmul %6, %8, %cst_15 {dimension_numbers = #tpu.dot_dimension_numbers<[1], [0], [0], [1], [0, 0, 1, 1], [], []>} : vector<32x64xf32>, vector<64x256xf32>, vector<32x256xf32> -> vector<32x256xf32>
    %c0_16 = arith.constant 0 : index
    %c1_17 = arith.constant 1 : index
    %c0_18 = arith.constant 0 : index
    %10 = vector.load %arg5[%c0_16, %c1_17, %c0_18] : memref<2x18x64xf32, #tpu.memory_space<vmem>>, vector<2x16x64xf32>
    %11 = vector.shape_cast %10 : vector<2x16x64xf32> to vector<32x64xf32>
    %c1_19 = arith.constant 1 : index
    %c0_20 = arith.constant 0 : index
    %c0_21 = arith.constant 0 : index
    %12 = vector.load %arg1[%c1_19, %c0_20, %c0_21] : memref<3x64x256xf32, #tpu.memory_space<vmem>>, vector<1x64x256xf32>
    %13 = vector.shape_cast %12 : vector<1x64x256xf32> to vector<64x256xf32>
    %cst_22 = arith.constant dense<0.000000e+00> : vector<32x256xf32>
    %14 = tpu.matmul %11, %13, %cst_22 {dimension_numbers = #tpu.dot_dimension_numbers<[1], [0], [0], [1], [0, 0, 1, 1], [], []>} : vector<32x64xf32>, vector<64x256xf32>, vector<32x256xf32> -> vector<32x256xf32>
    %15 = arith.addf %9, %14 : vector<32x256xf32>
    %c0_23 = arith.constant 0 : index
    %c2 = arith.constant 2 : index
    %c0_24 = arith.constant 0 : index
    %16 = vector.load %arg5[%c0_23, %c2, %c0_24] : memref<2x18x64xf32, #tpu.memory_space<vmem>>, vector<2x16x64xf32>
    %17 = vector.shape_cast %16 : vector<2x16x64xf32> to vector<32x64xf32>
    %c2_25 = arith.constant 2 : index
    %c0_26 = arith.constant 0 : index
    %c0_27 = arith.constant 0 : index
    %18 = vector.load %arg1[%c2_25, %c0_26, %c0_27] : memref<3x64x256xf32, #tpu.memory_space<vmem>>, vector<1x64x256xf32>
    %19 = vector.shape_cast %18 : vector<1x64x256xf32> to vector<64x256xf32>
    %cst_28 = arith.constant dense<0.000000e+00> : vector<32x256xf32>
    %20 = tpu.matmul %17, %19, %cst_28 {dimension_numbers = #tpu.dot_dimension_numbers<[1], [0], [0], [1], [0, 0, 1, 1], [], []>} : vector<32x64xf32>, vector<64x256xf32>, vector<32x256xf32> -> vector<32x256xf32>
    %21 = arith.addf %15, %20 : vector<32x256xf32>
    %22 = vector.extract_strided_slice %21 {offsets = [0, 0], sizes = [32, 128], strides = [1, 1]} : vector<32x256xf32> to vector<32x128xf32>
    %c0_29 = arith.constant 0 : index
    %c0_30 = arith.constant 0 : index
    %23 = vector.load %arg3[%c0_29, %c0_30] : memref<6x128xf32, #tpu.memory_space<vmem>>, vector<1x128xf32>
    %c1_31 = arith.constant 1 : index
    %c0_32 = arith.constant 0 : index
    %24 = vector.load %arg3[%c1_31, %c0_32] : memref<6x128xf32, #tpu.memory_space<vmem>>, vector<1x128xf32>
    %cst_33 = arith.constant dense<0.000000e+00> : vector<128xf32>
    %25 = vector.multi_reduction <add>, %22, %cst_33 [0] : vector<32x128xf32> to vector<128xf32>
    %26 = vector.shape_cast %25 : vector<128xf32> to vector<1x128xf32>
    %27 = arith.mulf %22, %22 : vector<32x128xf32>
    %cst_34 = arith.constant dense<0.000000e+00> : vector<128xf32>
    %28 = vector.multi_reduction <add>, %27, %cst_34 [0] : vector<32x128xf32> to vector<128xf32>
    %29 = vector.shape_cast %28 : vector<128xf32> to vector<1x128xf32>
    %c8_i32 = arith.constant 8 : i32
    %30 = tpu.dynamic_rotate %26 by %c8_i32 dim 1 : vector<1x128xf32>, i32 -> vector<1x128xf32>
    %31 = arith.addf %26, %30 : vector<1x128xf32>
    %c8_i32_35 = arith.constant 8 : i32
    %32 = tpu.dynamic_rotate %29 by %c8_i32_35 dim 1 : vector<1x128xf32>, i32 -> vector<1x128xf32>
    %33 = arith.addf %29, %32 : vector<1x128xf32>
    %c16_i32 = arith.constant 16 : i32
    %34 = tpu.dynamic_rotate %31 by %c16_i32 dim 1 : vector<1x128xf32>, i32 -> vector<1x128xf32>
    %35 = arith.addf %31, %34 : vector<1x128xf32>
    %c16_i32_36 = arith.constant 16 : i32
    %36 = tpu.dynamic_rotate %33 by %c16_i32_36 dim 1 : vector<1x128xf32>, i32 -> vector<1x128xf32>
    %37 = arith.addf %33, %36 : vector<1x128xf32>
    %c32_i32 = arith.constant 32 : i32
    %38 = tpu.dynamic_rotate %35 by %c32_i32 dim 1 : vector<1x128xf32>, i32 -> vector<1x128xf32>
    %39 = arith.addf %35, %38 : vector<1x128xf32>
    %c32_i32_37 = arith.constant 32 : i32
    %40 = tpu.dynamic_rotate %37 by %c32_i32_37 dim 1 : vector<1x128xf32>, i32 -> vector<1x128xf32>
    %41 = arith.addf %37, %40 : vector<1x128xf32>
    %c64_i32 = arith.constant 64 : i32
    %42 = tpu.dynamic_rotate %39 by %c64_i32 dim 1 : vector<1x128xf32>, i32 -> vector<1x128xf32>
    %43 = arith.addf %39, %42 : vector<1x128xf32>
    %c64_i32_38 = arith.constant 64 : i32
    %44 = tpu.dynamic_rotate %41 by %c64_i32_38 dim 1 : vector<1x128xf32>, i32 -> vector<1x128xf32>
    %45 = arith.addf %41, %44 : vector<1x128xf32>
    %cst_39 = arith.constant 0.001953125 : f32
    %46 = vector.broadcast %cst_39 : f32 to vector<1x128xf32>
    %47 = arith.mulf %43, %46 : vector<1x128xf32>
    %cst_40 = arith.constant 0.001953125 : f32
    %48 = vector.broadcast %cst_40 : f32 to vector<1x128xf32>
    %49 = arith.mulf %45, %48 : vector<1x128xf32>
    %50 = arith.mulf %47, %47 : vector<1x128xf32>
    %51 = arith.subf %49, %50 : vector<1x128xf32>
    %cst_41 = arith.constant 9.99999974E-6 : f32
    %52 = vector.broadcast %cst_41 : f32 to vector<1x128xf32>
    %53 = arith.addf %51, %52 : vector<1x128xf32>
    %54 = math.rsqrt %53 : vector<1x128xf32>
    %55 = arith.mulf %23, %54 : vector<1x128xf32>
    %56 = vector.broadcast %55 : vector<1x128xf32> to vector<32x128xf32>
    %57 = arith.mulf %22, %56 : vector<32x128xf32>
    %58 = arith.mulf %47, %55 : vector<1x128xf32>
    %59 = arith.subf %24, %58 : vector<1x128xf32>
    %60 = vector.broadcast %59 : vector<1x128xf32> to vector<32x128xf32>
    %61 = arith.addf %57, %60 : vector<32x128xf32>
    %cst_42 = arith.constant 0.000000e+00 : f32
    %62 = vector.broadcast %cst_42 : f32 to vector<32x128xf32>
    %63 = arith.maximumf %61, %62 : vector<32x128xf32>
    %64 = vector.extract_strided_slice %21 {offsets = [0, 128], sizes = [32, 128], strides = [1, 1]} : vector<32x256xf32> to vector<32x128xf32>
    %c2_43 = arith.constant 2 : index
    %c0_44 = arith.constant 0 : index
    %65 = vector.load %arg3[%c2_43, %c0_44] : memref<6x128xf32, #tpu.memory_space<vmem>>, vector<1x128xf32>
    %c3 = arith.constant 3 : index
    %c0_45 = arith.constant 0 : index
    %66 = vector.load %arg3[%c3, %c0_45] : memref<6x128xf32, #tpu.memory_space<vmem>>, vector<1x128xf32>
    %cst_46 = arith.constant dense<0.000000e+00> : vector<128xf32>
    %67 = vector.multi_reduction <add>, %64, %cst_46 [0] : vector<32x128xf32> to vector<128xf32>
    %68 = vector.shape_cast %67 : vector<128xf32> to vector<1x128xf32>
    %69 = arith.mulf %64, %64 : vector<32x128xf32>
    %cst_47 = arith.constant dense<0.000000e+00> : vector<128xf32>
    %70 = vector.multi_reduction <add>, %69, %cst_47 [0] : vector<32x128xf32> to vector<128xf32>
    %71 = vector.shape_cast %70 : vector<128xf32> to vector<1x128xf32>
    %c8_i32_48 = arith.constant 8 : i32
    %72 = tpu.dynamic_rotate %68 by %c8_i32_48 dim 1 : vector<1x128xf32>, i32 -> vector<1x128xf32>
    %73 = arith.addf %68, %72 : vector<1x128xf32>
    %c8_i32_49 = arith.constant 8 : i32
    %74 = tpu.dynamic_rotate %71 by %c8_i32_49 dim 1 : vector<1x128xf32>, i32 -> vector<1x128xf32>
    %75 = arith.addf %71, %74 : vector<1x128xf32>
    %c16_i32_50 = arith.constant 16 : i32
    %76 = tpu.dynamic_rotate %73 by %c16_i32_50 dim 1 : vector<1x128xf32>, i32 -> vector<1x128xf32>
    %77 = arith.addf %73, %76 : vector<1x128xf32>
    %c16_i32_51 = arith.constant 16 : i32
    %78 = tpu.dynamic_rotate %75 by %c16_i32_51 dim 1 : vector<1x128xf32>, i32 -> vector<1x128xf32>
    %79 = arith.addf %75, %78 : vector<1x128xf32>
    %c32_i32_52 = arith.constant 32 : i32
    %80 = tpu.dynamic_rotate %77 by %c32_i32_52 dim 1 : vector<1x128xf32>, i32 -> vector<1x128xf32>
    %81 = arith.addf %77, %80 : vector<1x128xf32>
    %c32_i32_53 = arith.constant 32 : i32
    %82 = tpu.dynamic_rotate %79 by %c32_i32_53 dim 1 : vector<1x128xf32>, i32 -> vector<1x128xf32>
    %83 = arith.addf %79, %82 : vector<1x128xf32>
    %c64_i32_54 = arith.constant 64 : i32
    %84 = tpu.dynamic_rotate %81 by %c64_i32_54 dim 1 : vector<1x128xf32>, i32 -> vector<1x128xf32>
    %85 = arith.addf %81, %84 : vector<1x128xf32>
    %c64_i32_55 = arith.constant 64 : i32
    %86 = tpu.dynamic_rotate %83 by %c64_i32_55 dim 1 : vector<1x128xf32>, i32 -> vector<1x128xf32>
    %87 = arith.addf %83, %86 : vector<1x128xf32>
    %cst_56 = arith.constant 0.001953125 : f32
    %88 = vector.broadcast %cst_56 : f32 to vector<1x128xf32>
    %89 = arith.mulf %85, %88 : vector<1x128xf32>
    %cst_57 = arith.constant 0.001953125 : f32
    %90 = vector.broadcast %cst_57 : f32 to vector<1x128xf32>
    %91 = arith.mulf %87, %90 : vector<1x128xf32>
    %92 = arith.mulf %89, %89 : vector<1x128xf32>
    %93 = arith.subf %91, %92 : vector<1x128xf32>
    %cst_58 = arith.constant 9.99999974E-6 : f32
    %94 = vector.broadcast %cst_58 : f32 to vector<1x128xf32>
    %95 = arith.addf %93, %94 : vector<1x128xf32>
    %96 = math.rsqrt %95 : vector<1x128xf32>
    %97 = arith.mulf %65, %96 : vector<1x128xf32>
    %98 = vector.broadcast %97 : vector<1x128xf32> to vector<32x128xf32>
    %99 = arith.mulf %64, %98 : vector<32x128xf32>
    %100 = arith.mulf %89, %97 : vector<1x128xf32>
    %101 = arith.subf %66, %100 : vector<1x128xf32>
    %102 = vector.broadcast %101 : vector<1x128xf32> to vector<32x128xf32>
    %103 = arith.addf %99, %102 : vector<32x128xf32>
    %cst_59 = arith.constant 0.000000e+00 : f32
    %104 = vector.broadcast %cst_59 : f32 to vector<2x1x128xf32>
    %c0_60 = arith.constant 0 : index
    %c0_61 = arith.constant 0 : index
    %c0_62 = arith.constant 0 : index
    %105 = vector.load %arg6[%c0_60, %c0_61, %c0_62] : memref<2x18x128xf32, #tpu.memory_space<vmem>>, vector<2x1x128xf32>
    tpu.vector_store %arg6[%c0_60, %c0_61, %c0_62], %104 {strides = array<i32>} : memref<2x18x128xf32, #tpu.memory_space<vmem>>, vector<2x1x128xf32>,
    %c0_63 = arith.constant 0 : index
    %c17_64 = arith.constant 17 : index
    %c0_65 = arith.constant 0 : index
    %106 = vector.load %arg6[%c0_63, %c17_64, %c0_65] : memref<2x18x128xf32, #tpu.memory_space<vmem>>, vector<2x1x128xf32>
    tpu.vector_store %arg6[%c0_63, %c17_64, %c0_65], %104 {strides = array<i32>} : memref<2x18x128xf32, #tpu.memory_space<vmem>>, vector<2x1x128xf32>,
    %107 = vector.shape_cast %63 : vector<32x128xf32> to vector<2x16x128xf32>
    %c0_66 = arith.constant 0 : index
    %c1_67 = arith.constant 1 : index
    %c0_68 = arith.constant 0 : index
    %108 = vector.load %arg6[%c0_66, %c1_67, %c0_68] : memref<2x18x128xf32, #tpu.memory_space<vmem>>, vector<2x16x128xf32>
    tpu.vector_store %arg6[%c0_66, %c1_67, %c0_68], %107 {strides = array<i32>} : memref<2x18x128xf32, #tpu.memory_space<vmem>>, vector<2x16x128xf32>,
    %c0_69 = arith.constant 0 : index
    %c0_70 = arith.constant 0 : index
    %c0_71 = arith.constant 0 : index
    %109 = vector.load %arg6[%c0_69, %c0_70, %c0_71] : memref<2x18x128xf32, #tpu.memory_space<vmem>>, vector<2x16x128xf32>
    %110 = vector.shape_cast %109 : vector<2x16x128xf32> to vector<32x128xf32>
    %c0_72 = arith.constant 0 : index
    %c0_73 = arith.constant 0 : index
    %c0_74 = arith.constant 0 : index
    %111 = vector.load %arg2[%c0_72, %c0_73, %c0_74] : memref<3x128x128xf32, #tpu.memory_space<vmem>>, vector<1x128x128xf32>
    %112 = vector.shape_cast %111 : vector<1x128x128xf32> to vector<128x128xf32>
    %cst_75 = arith.constant dense<0.000000e+00> : vector<32x128xf32>
    %113 = tpu.matmul %110, %112, %cst_75 {dimension_numbers = #tpu.dot_dimension_numbers<[1], [0], [0], [1], [0, 0, 1, 1], [], []>} : vector<32x128xf32>, vector<128x128xf32>, vector<32x128xf32> -> vector<32x128xf32>
    %c0_76 = arith.constant 0 : index
    %c1_77 = arith.constant 1 : index
    %c0_78 = arith.constant 0 : index
    %114 = vector.load %arg6[%c0_76, %c1_77, %c0_78] : memref<2x18x128xf32, #tpu.memory_space<vmem>>, vector<2x16x128xf32>
    %115 = vector.shape_cast %114 : vector<2x16x128xf32> to vector<32x128xf32>
    %c1_79 = arith.constant 1 : index
    %c0_80 = arith.constant 0 : index
    %c0_81 = arith.constant 0 : index
    %116 = vector.load %arg2[%c1_79, %c0_80, %c0_81] : memref<3x128x128xf32, #tpu.memory_space<vmem>>, vector<1x128x128xf32>
    %117 = vector.shape_cast %116 : vector<1x128x128xf32> to vector<128x128xf32>
    %cst_82 = arith.constant dense<0.000000e+00> : vector<32x128xf32>
    %118 = tpu.matmul %115, %117, %cst_82 {dimension_numbers = #tpu.dot_dimension_numbers<[1], [0], [0], [1], [0, 0, 1, 1], [], []>} : vector<32x128xf32>, vector<128x128xf32>, vector<32x128xf32> -> vector<32x128xf32>
    %119 = arith.addf %113, %118 : vector<32x128xf32>
    %c0_83 = arith.constant 0 : index
    %c2_84 = arith.constant 2 : index
    %c0_85 = arith.constant 0 : index
    %120 = vector.load %arg6[%c0_83, %c2_84, %c0_85] : memref<2x18x128xf32, #tpu.memory_space<vmem>>, vector<2x16x128xf32>
    %121 = vector.shape_cast %120 : vector<2x16x128xf32> to vector<32x128xf32>
    %c2_86 = arith.constant 2 : index
    %c0_87 = arith.constant 0 : index
    %c0_88 = arith.constant 0 : index
    %122 = vector.load %arg2[%c2_86, %c0_87, %c0_88] : memref<3x128x128xf32, #tpu.memory_space<vmem>>, vector<1x128x128xf32>
    %123 = vector.shape_cast %122 : vector<1x128x128xf32> to vector<128x128xf32>
    %cst_89 = arith.constant dense<0.000000e+00> : vector<32x128xf32>
    %124 = tpu.matmul %121, %123, %cst_89 {dimension_numbers = #tpu.dot_dimension_numbers<[1], [0], [0], [1], [0, 0, 1, 1], [], []>} : vector<32x128xf32>, vector<128x128xf32>, vector<32x128xf32> -> vector<32x128xf32>
    %125 = arith.addf %119, %124 : vector<32x128xf32>
    %c4 = arith.constant 4 : index
    %c0_90 = arith.constant 0 : index
    %126 = vector.load %arg3[%c4, %c0_90] : memref<6x128xf32, #tpu.memory_space<vmem>>, vector<1x128xf32>
    %c5 = arith.constant 5 : index
    %c0_91 = arith.constant 0 : index
    %127 = vector.load %arg3[%c5, %c0_91] : memref<6x128xf32, #tpu.memory_space<vmem>>, vector<1x128xf32>
    %cst_92 = arith.constant dense<0.000000e+00> : vector<128xf32>
    %128 = vector.multi_reduction <add>, %125, %cst_92 [0] : vector<32x128xf32> to vector<128xf32>
    %129 = vector.shape_cast %128 : vector<128xf32> to vector<1x128xf32>
    %130 = arith.mulf %125, %125 : vector<32x128xf32>
    %cst_93 = arith.constant dense<0.000000e+00> : vector<128xf32>
    %131 = vector.multi_reduction <add>, %130, %cst_93 [0] : vector<32x128xf32> to vector<128xf32>
    %132 = vector.shape_cast %131 : vector<128xf32> to vector<1x128xf32>
    %c8_i32_94 = arith.constant 8 : i32
    %133 = tpu.dynamic_rotate %129 by %c8_i32_94 dim 1 : vector<1x128xf32>, i32 -> vector<1x128xf32>
    %134 = arith.addf %129, %133 : vector<1x128xf32>
    %c8_i32_95 = arith.constant 8 : i32
    %135 = tpu.dynamic_rotate %132 by %c8_i32_95 dim 1 : vector<1x128xf32>, i32 -> vector<1x128xf32>
    %136 = arith.addf %132, %135 : vector<1x128xf32>
    %c16_i32_96 = arith.constant 16 : i32
    %137 = tpu.dynamic_rotate %134 by %c16_i32_96 dim 1 : vector<1x128xf32>, i32 -> vector<1x128xf32>
    %138 = arith.addf %134, %137 : vector<1x128xf32>
    %c16_i32_97 = arith.constant 16 : i32
    %139 = tpu.dynamic_rotate %136 by %c16_i32_97 dim 1 : vector<1x128xf32>, i32 -> vector<1x128xf32>
    %140 = arith.addf %136, %139 : vector<1x128xf32>
    %c32_i32_98 = arith.constant 32 : i32
    %141 = tpu.dynamic_rotate %138 by %c32_i32_98 dim 1 : vector<1x128xf32>, i32 -> vector<1x128xf32>
    %142 = arith.addf %138, %141 : vector<1x128xf32>
    %c32_i32_99 = arith.constant 32 : i32
    %143 = tpu.dynamic_rotate %140 by %c32_i32_99 dim 1 : vector<1x128xf32>, i32 -> vector<1x128xf32>
    %144 = arith.addf %140, %143 : vector<1x128xf32>
    %c64_i32_100 = arith.constant 64 : i32
    %145 = tpu.dynamic_rotate %142 by %c64_i32_100 dim 1 : vector<1x128xf32>, i32 -> vector<1x128xf32>
    %146 = arith.addf %142, %145 : vector<1x128xf32>
    %c64_i32_101 = arith.constant 64 : i32
    %147 = tpu.dynamic_rotate %144 by %c64_i32_101 dim 1 : vector<1x128xf32>, i32 -> vector<1x128xf32>
    %148 = arith.addf %144, %147 : vector<1x128xf32>
    %cst_102 = arith.constant 0.001953125 : f32
    %149 = vector.broadcast %cst_102 : f32 to vector<1x128xf32>
    %150 = arith.mulf %146, %149 : vector<1x128xf32>
    %cst_103 = arith.constant 0.001953125 : f32
    %151 = vector.broadcast %cst_103 : f32 to vector<1x128xf32>
    %152 = arith.mulf %148, %151 : vector<1x128xf32>
    %153 = arith.mulf %150, %150 : vector<1x128xf32>
    %154 = arith.subf %152, %153 : vector<1x128xf32>
    %cst_104 = arith.constant 9.99999974E-6 : f32
    %155 = vector.broadcast %cst_104 : f32 to vector<1x128xf32>
    %156 = arith.addf %154, %155 : vector<1x128xf32>
    %157 = math.rsqrt %156 : vector<1x128xf32>
    %158 = arith.mulf %126, %157 : vector<1x128xf32>
    %159 = vector.broadcast %158 : vector<1x128xf32> to vector<32x128xf32>
    %160 = arith.mulf %125, %159 : vector<32x128xf32>
    %161 = arith.mulf %150, %158 : vector<1x128xf32>
    %162 = arith.subf %127, %161 : vector<1x128xf32>
    %163 = vector.broadcast %162 : vector<1x128xf32> to vector<32x128xf32>
    %164 = arith.addf %160, %163 : vector<32x128xf32>
    %165 = arith.addf %164, %103 : vector<32x128xf32>
    %cst_105 = arith.constant 0.000000e+00 : f32
    %166 = vector.broadcast %cst_105 : f32 to vector<32x128xf32>
    %167 = arith.maximumf %165, %166 : vector<32x128xf32>
    %c0_106 = arith.constant 0 : index
    %c0_107 = arith.constant 0 : index
    %168 = vector.load %arg4[%c0_106, %c0_107] : memref<32x128xf32, #tpu.memory_space<vmem>>, vector<32x128xf32>
    tpu.vector_store %arg4[%c0_106, %c0_107], %167 {strides = array<i32>} : memref<32x128xf32, #tpu.memory_space<vmem>>, vector<32x128xf32>,
    return
  }
}

</mosaic_0001>

<bundles_post_ra>
// kernel: tpu_custom_call.1
= control target key start
LH: loop header
LB: loop body
LE: loop exit
PB: predicated region body
PF: predicated region fallthrough
CT: control target
= control target key end

     0   :  { %9 = vsyncpa [#allocation5], 0  ;;  %s1769_s0 = inlined_call_operand.hbm [shape: f32[2,16,64], index: 0, kind: input, shape index: {}]   ;;  %s1770_s1 = inlined_call_operand.hbm [shape: f32[3,64,256], index: 1, kind: input, shape index: {}]   ;;  %s1771_s2 = inlined_call_operand.hbm [shape: f32[3,128,128], index: 2, kind: input, shape index: {}]   ;;  %s1772_s3 = inlined_call_operand.vmem [shape: f32[6,128], index: 3, kind: input, shape index: {}]   ;;  %s1773_s4 = inlined_call_operand.hbm [shape: f32[32,128], index: 4, kind: output, shape index: {}]  }
   0x1   :  { %10 = vsyncpa [#allocation8], 0 }
   0x2   :  { %11 = vsyncpa [#allocation6], 0  ;;  %s1493_s15 = smov [#allocation7]   ;;  %s1399_s19 = scalar_lea.hbm %s1770_s1, 6144 }
   0x3   :  { %s29_s16 = sshll.u32 %s1493_s15, 4  ;;  %p1400_p0 = scmp.ne.s32.totalorder %s1770_s1, %s1399_s19  ;;  %s30_s16 = int_to_ptr.vmem [resolvable:$true] %s29_s16 }
   0x4   :  { %p1403_p1 = scmp.lt.u32.totalorder %s1399_s19, %s1770_s1 }
   0x6   :  { %p1405_p2 = pnand %p1403_p1, %p1400_p0 }
   0x8   :  { %1408 = shalt.err (!%p1405_p2)
}
   0x9   :  { %s1409_s24 = scalar_lea.vmem %s30_s16, 6144  ;;  %p1414_p4 = scmp.lt.s32.totalorder %s30_s16, %s30_s16 }
   0xa   :  { %p1410_p3 = scmp.ne.s32.totalorder %s30_s16, %s1409_s24  ;;  %p1415_p5 = scmp.lt.s32.totalorder %s1409_s24, %s1409_s24 }
   0xc   :  { %p1416_p6 = por %p1415_p5, %p1414_p4 }
   0xe   :  { %p1417_p7 = pnand %p1416_p6, %p1410_p3 }
  0x10   :  { %1420 = shalt.err (!%p1417_p7)
}
  0x11   :  { %s1494_s25 = smov 256   ;;  %s1495_s26 = smov 16  }
  0x12   :  { %35 = dma.hbm_to_vmem [thread:$0]  %s1770_s1, 6144, %s30_s16, [#allocation8], %s1494_s25, %s1494_s25, %s1495_s26  }
  0x13   :  { %s1496_s29 = smov [#allocation4]   ;;  %s1421_s7 = scalar_lea.hbm %s1769_s0, 512 }
  0x14   :  { %s17_s30 = sshll.u32 %s1496_s29, 4  ;;  %p1422_p8 = scmp.ne.s32.totalorder %s1769_s0, %s1421_s7  ;;  %s18_s30 = int_to_ptr.vmem [resolvable:$true] %s17_s30 }
  0x15   :  { %p1425_p9 = scmp.lt.u32.totalorder %s1421_s7, %s1769_s0 }
  0x17   :  { %p1427_p10 = pnand %p1425_p9, %p1422_p8 }
  0x19   :  { %1430 = shalt.err (!%p1427_p10)
}
  0x1a   :  { %s1431_s12 = scalar_lea.vmem %s18_s30, 512  ;;  %p1436_p12 = scmp.lt.s32.totalorder %s18_s30, %s18_s30 }
  0x1b   :  { %p1432_p11 = scmp.ne.s32.totalorder %s18_s30, %s1431_s12  ;;  %p1437_p13 = scmp.lt.s32.totalorder %s1431_s12, %s1431_s12 }
  0x1d   :  { %p1438_p0 = por %p1437_p13, %p1436_p12 }
  0x1f   :  { %p1439_p1 = pnand %p1438_p0, %p1432_p11 }
  0x21   :  { %1442 = shalt.err (!%p1439_p1)
}
  0x22   :  { %s1497_s1 = smov 128   ;;  %s1498_s13 = smov 8  }
  0x23   :  { %23 = dma.hbm_to_vmem [thread:$0]  %s1769_s0, 512, %s18_s30, [#allocation5], %s1497_s1, %s1497_s1, %s1498_s13  }
  0x24   :  { %s1499_s16 = smov [#allocation9]   ;;  %s1443_s20 = scalar_lea.hbm %s1771_s2, 6144 }
  0x25   :  { %s41_s17 = sshll.u32 %s1499_s16, 4  ;;  %p1444_p2 = scmp.ne.s32.totalorder %s1771_s2, %s1443_s20  ;;  %s42_s17 = int_to_ptr.vmem [resolvable:$true] %s41_s17 }
  0x26   :  { %p1447_p3 = scmp.lt.u32.totalorder %s1443_s20, %s1771_s2 }
  0x28   :  { %p1449_p4 = pnand %p1447_p3, %p1444_p2 }
  0x2a   :  { %1452 = shalt.err (!%p1449_p4)
}
  0x2b   :  { %s1453_s25 = scalar_lea.vmem %s42_s17, 6144  ;;  %p1458_p6 = scmp.lt.s32.totalorder %s42_s17, %s42_s17 }
  0x2c   :  { %p1454_p5 = scmp.ne.s32.totalorder %s42_s17, %s1453_s25  ;;  %p1459_p7 = scmp.lt.s32.totalorder %s1453_s25, %s1453_s25 }
  0x2e   :  { %p1460_p8 = por %p1459_p7, %p1458_p6 }
  0x30   :  { %p1461_p9 = pnand %p1460_p8, %p1454_p5 }
  0x32   :  { %1464 = shalt.err (!%p1461_p9)
}
  0x33   :  { %47 = dma.hbm_to_vmem [thread:$0]  %s1771_s2, 6144, %s42_s17, [#allocation8], %s1497_s1, %s1497_s1, %s1498_s13  }
  0x34   :  { %1487 = dma.done.wait [#allocation5], 512  }
  0x35   :  { %1488 = vsyncadd [#allocation5], 4294966784 }
  0x36   :  { %1489 = dma.done.wait [#allocation8], 12288  }
  0x37   :  { %1490 = vsyncadd [#allocation8], 4294955008  ;;  %vm59_vm0 = vcmask 516096   ;;  %v1500_v0 = vmov 0.0   ;;  %v99_v1 = vld [vmem:[#allocation7 + $0x88] sm:$0xff]  ;;  %v101_v2 = vld [vmem:[#allocation7 + $0x98] sm:$0xff] }
  0x38   :  { %190 = vmatprep.mubr.f32.mxu0 %v1500_v0  ;;  %596 = vst [vmem:[#allocation3] sm:$0x1] %v1500_v0  ;;  %597 = vst [vmem:[#allocation3 + $0x18] sm:$0x1] %v1500_v0  ;;  %v98_v3 = vld [vmem:[#allocation7 + $0x80] sm:$0xff]  ;;  %v1214_v4 = vpack.c.bf16 %v101_v2, %v99_v1  ;;  %v100_v5 = vld [vmem:[#allocation7 + $0x90] sm:$0xff] }
  0x39   :  { %598 = vst [vmem:[#allocation3 + $0x11] sm:$0x1] %v1500_v0  ;;  %599 = vst [vmem:[#allocation3 + $0x29] sm:$0x1] %v1500_v0  ;;  %v103_v6 = vld [vmem:[#allocation7 + $0xa8] sm:$0xff]  ;;  %v105_v7 = vld [vmem:[#allocation7 + $0xb8] sm:$0xff]  ;;  %v1216_v8 = vpack.c.bf16 %v100_v5, %v98_v3 }
  0x3a   :  { %60 = vst.msk [vmem:[#allocation2] sm:$0x1] %vm59_vm0, %v1500_v0  ;;  %61 = vst.msk [vmem:[#allocation2 + $0x18] sm:$0x1] %vm59_vm0, %v1500_v0  ;;  %v1218_v9 = vpack.c.bf16 %v105_v7, %v103_v6  ;;  %v102_v10 = vld [vmem:[#allocation7 + $0xa0] sm:$0xff]  ;;  %v104_v11 = vld [vmem:[#allocation7 + $0xb0] sm:$0xff]  ;;  %1215 = vmatprep.subr.bf16.mxu0 %v1214_v4 }
  0x3b   :  { %62 = vst.msk [vmem:[#allocation2 + $0x11] sm:$0x1] %vm59_vm0, %v1500_v0  ;;  %63 = vst.msk [vmem:[#allocation2 + $0x29] sm:$0x1] %vm59_vm0, %v1500_v0  ;;  %v107_v12 = vld [vmem:[#allocation7 + $0xc8] sm:$0xff]  ;;  %v109_v13 = vld [vmem:[#allocation7 + $0xd8] sm:$0xff]  ;;  %1217 = vmatpush1.bf16.msra.mxu0 %v1216_v8  ;;  %v1220_v14 = vpack.c.bf16 %v104_v11, %v102_v10 }
  0x3c   :  { %vm68_vm1 = vcmask 523264   ;;  %1219 = vmatprep.subr.bf16.mxu0 %v1218_v9  ;;  %v1222_v15 = vpack.c.bf16 %v109_v13, %v107_v12  ;;  %v106_v16 = vld [vmem:[#allocation7 + $0xc0] sm:$0xff]  ;;  %v108_v17 = vld [vmem:[#allocation7 + $0xd0] sm:$0xff]  ;;  %v111_v19 = vld [vmem:[#allocation7 + $0xe8] sm:$0xff]  ;;  %s1501_s2 = smov 32   ;;  %s1502_s28 = smov 64  }
  0x3d   :  { %v64_v18 = vld [vmem:[#allocation4] sm:$0xff]  ;;  %v113_v20 = vld [vmem:[#allocation7 + $0xf8] sm:$0xff]  ;;  %v65_v21 = vld [vmem:[#allocation4 + $0x8] sm:$0xff]  ;;  %v1224_v22 = vpack.c.bf16 %v108_v17, %v106_v16 }
  0x3e   :  { %69 = vst.msk [vmem:[#allocation2 + $0x1] sm:$0xff] %vm68_vm1, %v64_v18  ;;  %70 = vst.msk [vmem:[#allocation2 + $0x9] sm:$0xff] %vm68_vm1, %v65_v21  ;;  %v66_v23 = vld [vmem:[#allocation4 + $0x10] sm:$0xff]  ;;  %v1226_v24 = vpack.c.bf16 %v113_v20, %v111_v19  ;;  %v110_v25 = vld [vmem:[#allocation7 + $0xe0] sm:$0xff] }
  0x3f   :  { %1221 = vmatpush1.bf16.msra.mxu0 %v1220_v14  ;;  %v112_v26 = vld [vmem:[#allocation7 + $0xf0] sm:$0xff]  ;;  %71 = vst.msk [vmem:[#allocation2 + $0x19] sm:$0xff] %vm68_vm1, %v66_v23  ;;  %v78_v27 = vld [vmem:[#allocation7 + $0x8] sm:$0xff]  ;;  %v80_v28 = vld [vmem:[#allocation7 + $0x18] sm:$0xff] }
  0x40   :  { %1223 = vmatprep.subr.bf16.mxu0 %v1222_v15  ;;  %v67_v29 = vld [vmem:[#allocation4 + $0x18] sm:$0xff]  ;;  %v1228_v30 = vpack.c.bf16 %v112_v26, %v110_v25  ;;  %v1230_v31 = vpack.c.bf16 %v80_v28, %v78_v27  ;;  %v77_v32 = vld [vmem:[#allocation7] sm:$0xff]  ;;  %v79_v33 = vld [vmem:[#allocation7 + $0x10] sm:$0xff] }
  0x41   :  { %72 = vst.msk [vmem:[#allocation2 + $0x21] sm:$0xff] %vm68_vm1, %v67_v29  ;;  %v82_v34 = vld [vmem:[#allocation7 + $0x28] sm:$0xff]  ;;  %v84_v35 = vld [vmem:[#allocation7 + $0x38] sm:$0xff]  ;;  %v1232_v37 = vpack.c.bf16 %v79_v33, %v77_v32  ;;  %v81_v39 = vld [vmem:[#allocation7 + $0x20] sm:$0xff] }
  0x42   :  { %v1234_v38 = vpack.c.bf16 %v84_v35, %v82_v34  ;;  %v83_v40 = vld [vmem:[#allocation7 + $0x30] sm:$0xff]  ;;  %v86_v41 = vld [vmem:[#allocation7 + $0x48] sm:$0xff]  ;;  %v88_v42 = vld [vmem:[#allocation7 + $0x58] sm:$0xff] }
  0x43   :  { %1225 = vmatpush1.bf16.msra.mxu0 %v1224_v22  ;;  %v1236_v44 = vpack.c.bf16 %v83_v40, %v81_v39  ;;  %v1238_v45 = vpack.c.bf16 %v88_v42, %v86_v41  ;;  %v85_v46 = vld [vmem:[#allocation7 + $0x40] sm:$0xff]  ;;  %v87_v47 = vld [vmem:[#allocation7 + $0x50] sm:$0xff]  ;;  %v90_v48 = vld [vmem:[#allocation7 + $0x68] sm:$0xff] }
  0x44   :  { %1227 = vmatprep.subr.bf16.mxu0 %v1226_v24  ;;  %v92_v49 = vld [vmem:[#allocation7 + $0x78] sm:$0xff]  ;;  %v1240_v51 = vpack.c.bf16 %v87_v47, %v85_v46  ;;  %v89_v53 = vld [vmem:[#allocation7 + $0x60] sm:$0xff]  ;;  %v91_v54 = vld [vmem:[#allocation7 + $0x70] sm:$0xff] }
  0x45   :  { %v93_v36 = vld [vmem:[#allocation2 + $0x1] sm:$0xff]  ;;  %v94_v43 = vld [vmem:[#allocation2 + $0x9] sm:$0xff]  ;;  %v1242_v52 = vpack.c.bf16 %v92_v49, %v90_v48  ;;  %v324_v56 = vld [vmem:[#allocation7 + $0x118] sm:$0xff]  ;;  %v1244_v58 = vpack.c.bf16 %v91_v54, %v89_v53 }
  0x46   :  { %v95_v50 = vld [vmem:[#allocation2 + $0x19] sm:$0xff]  ;;  %v322_v55 = vld [vmem:[#allocation7 + $0x108] sm:$0xff]  ;;  %v323_v61 = vld [vmem:[#allocation7 + $0x110] sm:$0xff] }
  0x47   :  { %1229 = vmatpush1.bf16.msra.mxu0 %v1228_v30  ;;  %v1246_v59 = vpack.c.bf16 %v324_v56, %v322_v55  ;;  %v321_v60 = vld [vmem:[#allocation7 + $0x100] sm:$0xff]  ;;  %v326_v62 = vld [vmem:[#allocation7 + $0x128] sm:$0xff]  ;;  %v328_v63 = vld [vmem:[#allocation7 + $0x138] sm:$0xff] }
  0x48   :  { %1231 = vmatprep.subr.bf16.mxu0 %v1230_v31  ;;  %v96_v57 = vld [vmem:[#allocation2 + $0x21] sm:$0xff]  ;;  %v1248_v2 = vpack.c.bf16 %v323_v61, %v321_v60  ;;  %v1250_v3 = vpack.c.bf16 %v328_v63, %v326_v62  ;;  %v327_v5 = vld [vmem:[#allocation7 + $0x130] sm:$0xff]  ;;  %v332_v7 = vld [vmem:[#allocation7 + $0x158] sm:$0xff] }
  0x49   :  { %v73_v1 = vld [vmem:[#allocation2] sm:$0xff]  ;;  %v330_v6 = vld [vmem:[#allocation7 + $0x148] sm:$0xff]  ;;  %v331_v12 = vld [vmem:[#allocation7 + $0x150] sm:$0xff] }
  0x4a   :  { %1028 = vmatmul.mubr.msk.f32.vlgmr.msra.gmra.mrb[0].mxu0 %vm68_vm1, %v93_v36  ;;  %v325_v4 = vld [vmem:[#allocation7 + $0x120] sm:$0xff]  ;;  %v74_v8 = vld [vmem:[#allocation2 + $0x8] sm:$0xff]  ;;  %v1254_v10 = vpack.c.bf16 %v332_v7, %v330_v6  ;;  %v336_v14 = vld [vmem:[#allocation7 + $0x178] sm:$0xff] }
  0x4b   :  { %1233 = vmatpush1.bf16.msra.mxu0 %v1232_v37  ;;  %196 = vmatprep.mubr.f32.mxu0 %v1500_v0  ;;  %v1252_v9 = vpack.c.bf16 %v327_v5, %v325_v4  ;;  %v329_v11 = vld [vmem:[#allocation7 + $0x140] sm:$0xff]  ;;  %v334_v13 = vld [vmem:[#allocation7 + $0x168] sm:$0xff]  ;;  %v75_v15 = vld [vmem:[#allocation2 + $0x18] sm:$0xff] }
  0x4c   :  { %1235 = vmatprep.subr.bf16.mxu0 %v1234_v38  ;;  %v1256_v16 = vpack.c.bf16 %v331_v12, %v329_v11  ;;  %v1258_v17 = vpack.c.bf16 %v336_v14, %v334_v13  ;;  %v333_v18 = vld [vmem:[#allocation7 + $0x160] sm:$0xff]  ;;  %v335_v19 = vld [vmem:[#allocation7 + $0x170] sm:$0xff]  ;;  %v630_v14 = vld [vmem:[#allocation9 + $0x88] sm:$0xff] }
  0x4d   :  { %v76_v20 = vld [vmem:[#allocation2 + $0x20] sm:$0xff]  ;;  %v1260_v21 = vpack.c.bf16 %v335_v19, %v333_v18  ;;  %v317_v23 = vld [vmem:[#allocation2 + $0xa] sm:$0xff]  ;;  %v632_v19 = vld [vmem:[#allocation9 + $0x98] sm:$0xff] }
  0x4e   :  { %1029 = vmatmul.mubr.msk.f32.gmra.mrb[2].mxu0 %vm68_vm1, %v94_v43  ;;  %v316_v22 = vld [vmem:[#allocation2 + $0x2] sm:$0xff]  ;;  %v318_v24 = vld [vmem:[#allocation2 + $0x1a] sm:$0xff]  ;;  %v631_v18 = vld [vmem:[#allocation9 + $0x90] sm:$0xff] }
  0x4f   :  { %1237 = vmatpush1.bf16.msra.mxu0 %v1236_v44  ;;  %202 = vmatprep.mubr.f32.mxu0 %v1500_v0  ;;  %v319_v25 = vld [vmem:[#allocation2 + $0x22] sm:$0xff] }
  0x50   :  { %1239 = vmatprep.subr.bf16.mxu0 %v1238_v45  ;;  %v629_v13 = vld [vmem:[#allocation9 + $0x80] sm:$0xff] }
  0x52   :  { %1030 = vmatmul.mubr.msk.f32.gmra.mrb[4].mxu0 %vm68_vm1, %v95_v50 }
  0x53   :  { %1241 = vmatpush1.bf16.msra.mxu0 %v1240_v51  ;;  %208 = vmatprep.mubr.f32.mxu0 %v1500_v0 }
  0x54   :  { %1243 = vmatprep.subr.bf16.mxu0 %v1242_v52 }
  0x56   :  { %1031 = vmatmul.mubr.msk.f32.gmra.mrb[6].mxu0 %vm68_vm1, %v96_v57 }
  0x57   :  { %1245 = vmatpush1.bf16.msra.mxu0 %v1244_v58  ;;  %291 = vmatprep.mubr.f32.mxu0 %v1500_v0 }
  0x58   :  { %1247 = vmatprep.subr.bf16.mxu0 %v1246_v59 }
  0x5a   :  { %1032 = vmatmul.mubr.msk.f32.vlgmr.msra.gmra.mrb[0].mxu0 %vm68_vm1, %v73_v1 }
  0x5b   :  { %1249 = vmatpush1.bf16.msra.mxu0 %v1248_v2  ;;  %297 = vmatprep.mubr.f32.mxu0 %v1500_v0 }
  0x5c   :  { %1251 = vmatprep.subr.bf16.mxu0 %v1250_v3 }
  0x5e   :  { %1033 = vmatmul.mubr.msk.f32.gmra.mrb[2].mxu0 %vm68_vm1, %v74_v8 }
  0x5f   :  { %1253 = vmatpush1.bf16.msra.mxu0 %v1252_v9  ;;  %303 = vmatprep.mubr.f32.mxu0 %v1500_v0 }
  0x60   :  { %1255 = vmatprep.subr.bf16.mxu0 %v1254_v10 }
  0x62   :  { %1034 = vmatmul.mubr.msk.f32.gmra.mrb[4].mxu0 %vm68_vm1, %v75_v15 }
  0x63   :  { %1257 = vmatpush1.bf16.msra.mxu0 %v1256_v16  ;;  %309 = vmatprep.mubr.f32.mxu0 %v1500_v0 }
  0x64   :  { %1259 = vmatprep.subr.bf16.mxu0 %v1258_v17  ;;  %v1262_v17 = vpack.c.bf16 %v630_v14, %v629_v13  ;;  %v621_v13 = vld [vmem:[#allocation9 + $0x68] sm:$0xff] }
  0x66   :  { %1035 = vmatmul.mubr.msk.f32.gmra.mrb[6].mxu0 %vm68_vm1, %v76_v20 }
  0x67   :  { %1261 = vmatpush1.bf16.msra.mxu0 %v1260_v21  ;;  %413 = vmatprep.mubr.f32.mxu0 %v1500_v0 }
  0x68   :  { %1263 = vmatprep.subr.bf16.mxu0 %v1262_v17 }
  0x6a   :  { %1036 = vmatmul.mubr.msk.f32.vlgmr.msra.gmra.mrb[0].mxu0 %vm68_vm1, %v316_v22  ;;  %v1266_v22 = vpack.c.bf16 %v632_v19, %v631_v18  ;;  %v820_v18 = vld [vmem:[#allocation9 + $0x100] sm:$0xff]  ;;  %v821_v19 = vld [vmem:[#allocation9 + $0x108] sm:$0xff] }
  0x6b   :  { %419 = vmatprep.mubr.f32.mxu0 %v1500_v0  ;;  %1265 = vmatpush3.bf16.msra.mxu0 %v1262_v17 }
  0x6c   :  { %1267 = vmatprep.subr.bf16.mxu0 %v1266_v22 }
  0x6e   :  { %1037 = vmatmul.mubr.msk.f32.gmra.mrb[2].mxu0 %vm68_vm1, %v317_v23  ;;  %v608_v23 = vld [vmem:[#allocation9] sm:$0xff] }
  0x6f   :  { %425 = vmatprep.mubr.f32.mxu0 %v1500_v0  ;;  %1269 = vmatpush3.bf16.msra.mxu0 %v1266_v22 }
  0x72   :  { %1038 = vmatmul.mubr.msk.f32.gmra.mrb[4].mxu0 %vm68_vm1, %v318_v24  ;;  %v609_v24 = vld [vmem:[#allocation9 + $0x8] sm:$0xff] }
  0x73   :  { %431 = vmatprep.mubr.f32.mxu0 %v1500_v0 }
  0x76   :  { %1039 = vmatmul.mubr.msk.f32.gmra.mrb[6].mxu0 %vm68_vm1, %v319_v25 }
 0x13d   :  { %v1608_v26 = vpop.f32.mrb[0].mxu0 }
 0x13e   :  { %v1610_v27 = vpop.f32.mrb[1].mxu0  ;;  %v457_v29 = vmul.f32 %v1608_v26, %v1608_v26 }
 0x13f   :  { %v534_v0 = vmul.f32 %v1610_v27, %v1610_v27 }
 0x141   :  { %v1612_v28 = vpop.f32.mrb[2].mxu0 }
 0x142   :  { %v448_v30 = vadd.f32 %v1612_v28, %v1608_v26  ;;  %v458_v31 = vmul.f32 %v1612_v28, %v1612_v28  ;;  %v1620_v32 = vpop.f32.mrb[3].mxu0 }
 0x143   :  { %v525_v33 = vadd.f32 %v1620_v32, %v1610_v27  ;;  %v535_v34 = vmul.f32 %v1620_v32, %v1620_v32 }
 0x144   :  { %v461_v35 = vadd.f32 %v458_v31, %v457_v29  ;;  %v1294_v29 = vpack.c.bf16 %v609_v24, %v608_v23  ;;  %v634_v31 = vld [vmem:[#allocation9 + $0xa8] sm:$0xff] }
 0x145   :  { %v538_v36 = vadd.f32 %v535_v34, %v534_v0  ;;  %v1628_v37 = vpop.f32.mrb[4].mxu0 }
 0x146   :  { %v449_v38 = vadd.f32 %v448_v30, %v1628_v37  ;;  %v459_v39 = vmul.f32 %v1628_v37, %v1628_v37  ;;  %v1633_v40 = vpop.f32.mrb[5].mxu0  ;;  %v633_v30 = vld [vmem:[#allocation9 + $0xa0] sm:$0xff]  ;;  %1295 = vmatprep.subr.bf16.mxu1 %v1294_v29 }
 0x147   :  { %v526_v41 = vadd.f32 %v525_v33, %v1633_v40  ;;  %v536_v42 = vmul.f32 %v1633_v40, %v1633_v40  ;;  %1297 = vmatpush3.bf16.msra.mxu1 %v1294_v29 }
 0x148   :  { %v462_v43 = vadd.f32 %v461_v35, %v459_v39  ;;  %v1270_v35 = vpack.c.bf16 %v634_v31, %v633_v30 }
 0x149   :  { %v539_v44 = vadd.f32 %v538_v36, %v536_v42  ;;  %v1638_v45 = vpop.f32.mrb[6].mxu0  ;;  %v610_v36 = vld [vmem:[#allocation9 + $0x10] sm:$0xff] }
 0x14a   :  { %v450_v46 = vadd.f32 %v449_v38, %v1638_v45  ;;  %v460_v47 = vmul.f32 %v1638_v45, %v1638_v45  ;;  %v1643_v48 = vpop.f32.mrb[7].mxu0  ;;  %v611_v38 = vld [vmem:[#allocation9 + $0x18] sm:$0xff]  ;;  %1271 = vmatprep.subr.bf16.mxu0 %v1270_v35  ;;  %v635_v42 = vld [vmem:[#allocation9 + $0xb0] sm:$0xff] }
 0x14b   :  { %v527_v49 = vadd.f32 %v526_v41, %v1643_v48  ;;  %v537_v50 = vmul.f32 %v1643_v48, %v1643_v48  ;;  %v1298_v41 = vpack.c.bf16 %v611_v38, %v610_v36  ;;  %1273 = vmatpush3.bf16.msra.mxu0 %v1270_v35 }
 0x14c   :  { %v451_v51 = vrot.slane %v450_v46, 4  ;;  %v463_v52 = vadd.f32 %v462_v43, %v460_v47  ;;  %v636_v43 = vld [vmem:[#allocation9 + $0xb8] sm:$0xff] }
 0x14d   :  { %v540_v53 = vadd.f32 %v539_v44, %v537_v50  ;;  %v528_v10 = vrot.slane %v527_v49, 4  ;;  %1299 = vmatprep.subr.bf16.mxu1 %v1298_v41  ;;  %v612_v50 = vld [vmem:[#allocation9 + $0x20] sm:$0xff] }
 0x14e   :  { %v452_v54 = vadd.f32 %v451_v51, %v450_v46  ;;  %v464_v55 = vrot.slane %v463_v52, 4  ;;  %v613_v51 = vld [vmem:[#allocation9 + $0x28] sm:$0xff]  ;;  %1301 = vmatpush3.bf16.msra.mxu1 %v1298_v41  ;;  %v446_v41 = vld [vmem:[%s1772_s3] sm:$0x1] }
 0x14f   :  { %v529_v11 = vadd.f32 %v528_v10, %v527_v49  ;;  %v541_v12 = vrot.slane %v540_v53, 4  ;;  %v1274_v49 = vpack.c.bf16 %v636_v43, %v635_v42  ;;  %v644_v10 = vld [vmem:[#allocation9 + $0xf8] sm:$0xff] }
 0x150   :  { %v453_v56 = vrot.slane %v452_v54, 2  ;;  %v465_v57 = vadd.f32 %v464_v55, %v463_v52  ;;  %v1302_v52 = vpack.c.bf16 %v613_v51, %v612_v50 }
 0x151   :  { %v530_v15 = vrot.slane %v529_v11, 2  ;;  %v542_v16 = vadd.f32 %v541_v12, %v540_v53  ;;  %1275 = vmatprep.subr.bf16.mxu0 %v1274_v49  ;;  %v637_v53 = vld [vmem:[#allocation9 + $0xc0] sm:$0xff] }
 0x152   :  { %v454_v58 = vadd.f32 %v453_v56, %v452_v54  ;;  %v466_v59 = vrot.slane %v465_v57, 2  ;;  %v638_v54 = vld [vmem:[#allocation9 + $0xc8] sm:$0xff]  ;;  %1277 = vmatpush3.bf16.msra.mxu0 %v1274_v49  ;;  %1303 = vmatprep.subr.bf16.mxu1 %v1302_v52  ;;  %v620_v12 = vld [vmem:[#allocation9 + $0x60] sm:$0xff] }
 0x153   :  { %v531_v20 = vadd.f32 %v530_v15, %v529_v11  ;;  %v543_v21 = vrot.slane %v542_v16, 2  ;;  %v1278_v56 = vpack.c.bf16 %v638_v54, %v637_v53  ;;  %1305 = vmatpush3.bf16.msra.mxu1 %v1302_v52  ;;  %v1318_v14 = vpack.c.bf16 %v621_v13, %v620_v12  ;;  %v622_v15 = vld [vmem:[#allocation9 + $0x70] sm:$0xff]  ;;  %v829_v12 = vld [vmem:[#allocation9 + $0x148] sm:$0xff] }
 0x154   :  { %v455_v60 = vrot.slane %v454_v58, 1  ;;  %v467_v61 = vadd.f32 %v466_v59, %v465_v57  ;;  %v614_v57 = vld [vmem:[#allocation9 + $0x30] sm:$0xff] }
 0x155   :  { %v532_v33 = vrot.slane %v531_v20, 1  ;;  %v544_v34 = vadd.f32 %v543_v21, %v542_v16  ;;  %1279 = vmatprep.subr.bf16.mxu0 %v1278_v56  ;;  %v623_v16 = vld [vmem:[#allocation9 + $0x78] sm:$0xff] }
 0x156   :  { %v456_v62 = vadd.f32 %v455_v60, %v454_v58  ;;  %v468_v63 = vrot.slane %v467_v61, 1  ;;  %v615_v58 = vld [vmem:[#allocation9 + $0x38] sm:$0xff]  ;;  %v639_v60 = vld [vmem:[#allocation9 + $0xd0] sm:$0xff]  ;;  %1281 = vmatpush3.bf16.msra.mxu0 %v1278_v56  ;;  %v1322_v17 = vpack.c.bf16 %v623_v16, %v622_v15 }
 0x157   :  { %v1660_v46 = vadd.f32 %v532_v33, %v531_v20  ;;  %v545_v47 = vrot.slane %v544_v34, 1  ;;  %v1306_v59 = vpack.c.bf16 %v615_v58, %v614_v57  ;;  %v1326_v20 = vpack.c.bf16 %v821_v19, %v820_v18  ;;  %v831_v15 = vld [vmem:[#allocation9 + $0x158] sm:$0xff]  ;;  %v833_v18 = vld [vmem:[#allocation9 + $0x168] sm:$0xff] }
 0x158   :  { %470 = vrot.lane.b32.xlu0 %v456_v62, %s1498_s13  ;;  %v469_v1 = vadd.f32 %v468_v63, %v467_v61  ;;  %v640_v61 = vld [vmem:[#allocation9 + $0xd8] sm:$0xff]  ;;  %v616_v63 = vld [vmem:[#allocation9 + $0x40] sm:$0xff] }
 0x159   :  { %v1666_v55 = vadd.f32 %v545_v47, %v544_v34  ;;  %1307 = vmatprep.subr.bf16.mxu1 %v1306_v59 }
 0x15a   :  { %1309 = vmatpush3.bf16.msra.mxu1 %v1306_v59 }
 0x15c   :  { %473 = vrot.lane.b32.xlu0 %v469_v1, %s1498_s13 }
 0x1ca   :  { %v471_v2 = vpop.permute.xlu0 %470 }
 0x1cb   :  { %v472_v3 = vadd.f32 %v471_v2, %v456_v62  ;;  %v1282_v62 = vpack.c.bf16 %v640_v61, %v639_v60 }
 0x1cd   :  { %476 = vrot.lane.b32.xlu1 %v472_v3, %s1495_s26  ;;  %1283 = vmatprep.subr.bf16.mxu0 %v1282_v62 }
 0x1ce   :  { %v474_v4 = vpop.permute.xlu0 %473  ;;  %1285 = vmatpush3.bf16.msra.mxu0 %v1282_v62 }
 0x1cf   :  { %v475_v5 = vadd.f32 %v474_v4, %v469_v1  ;;  %v617_v1 = vld [vmem:[#allocation9 + $0x48] sm:$0xff] }
 0x1d0   :  { %v1310_v2 = vpack.c.bf16 %v617_v1, %v616_v63  ;;  %v642_v4 = vld [vmem:[#allocation9 + $0xe8] sm:$0xff] }
 0x1d1   :  { %479 = vrot.lane.b32.xlu1 %v475_v5, %s1495_s26 }
 0x1d2   :  { %1311 = vmatprep.subr.bf16.mxu1 %v1310_v2 }
 0x1d3   :  { %1313 = vmatpush3.bf16.msra.mxu1 %v1310_v2  ;;  %v824_v2 = vld [vmem:[#allocation9 + $0x120] sm:$0xff] }
 0x23f   :  { %v477_v6 = vpop.permute.xlu1 %476 }
 0x240   :  { %v478_v7 = vadd.f32 %v477_v6, %v472_v3  ;;  %v641_v3 = vld [vmem:[#allocation9 + $0xe0] sm:$0xff]  ;;  %v618_v6 = vld [vmem:[#allocation9 + $0x50] sm:$0xff] }
 0x242   :  { %482 = vrot.lane.b32.xlu0 %v478_v7, %s1501_s2 }
 0x243   :  { %v480_v8 = vpop.permute.xlu1 %479 }
 0x244   :  { %v481_v9 = vadd.f32 %v480_v8, %v475_v5  ;;  %v1286_v5 = vpack.c.bf16 %v642_v4, %v641_v3  ;;  %v825_v3 = vld [vmem:[#allocation9 + $0x128] sm:$0xff] }
 0x246   :  { %485 = vrot.lane.b32.xlu1 %v481_v9, %s1501_s2  ;;  %1287 = vmatprep.subr.bf16.mxu0 %v1286_v5 }
 0x247   :  { %1289 = vmatpush3.bf16.msra.mxu0 %v1286_v5  ;;  %v1334_v5 = vpack.c.bf16 %v825_v3, %v824_v2 }
 0x2b4   :  { %v483_v25 = vpop.permute.xlu0 %482 }
 0x2b5   :  { %v1654_v0 = vadd.f32 %v483_v25, %v478_v7  ;;  %v619_v7 = vld [vmem:[#allocation9 + $0x58] sm:$0xff] }
 0x2b6   :  { %v1314_v8 = vpack.c.bf16 %v619_v7, %v618_v6  ;;  %v826_v7 = vld [vmem:[#allocation9 + $0x130] sm:$0xff] }
 0x2b7   :  { %488 = vrot.lane.b32.xlu0 %v1654_v0, %s1502_s28 }
 0x2b8   :  { %v486_v39 = vpop.permute.xlu1 %485  ;;  %1315 = vmatprep.subr.bf16.mxu1 %v1314_v8 }
 0x2b9   :  { %v1658_v44 = vadd.f32 %v486_v39, %v481_v9  ;;  %v643_v9 = vld [vmem:[#allocation9 + $0xf0] sm:$0xff]  ;;  %1317 = vmatpush3.bf16.msra.mxu1 %v1314_v8  ;;  %v827_v8 = vld [vmem:[#allocation9 + $0x138] sm:$0xff] }
 0x2ba   :  { %v1290_v11 = vpack.c.bf16 %v644_v10, %v643_v9  ;;  %1319 = vmatprep.subr.bf16.mxu1 %v1318_v14  ;;  %v1338_v10 = vpack.c.bf16 %v827_v8, %v826_v7 }
 0x2bb   :  { %491 = vrot.lane.b32.xlu1 %v1658_v44, %s1502_s28  ;;  %547 = vrot.lane.b32.xlu0 %v1660_v46, %s1498_s13 }
 0x2bc   :  { %1291 = vmatprep.subr.bf16.mxu0 %v1290_v11 }
 0x2bd   :  { %1293 = vmatpush3.bf16.msra.mxu0 %v1290_v11  ;;  %1321 = vmatpush3.bf16.msra.mxu1 %v1318_v14  ;;  %v828_v11 = vld [vmem:[#allocation9 + $0x140] sm:$0xff]  ;;  %v830_v14 = vld [vmem:[#allocation9 + $0x150] sm:$0xff] }
 0x2be   :  { %1323 = vmatprep.subr.bf16.mxu1 %v1322_v17  ;;  %v1342_v13 = vpack.c.bf16 %v829_v12, %v828_v11  ;;  %v1346_v16 = vpack.c.bf16 %v831_v15, %v830_v14 }
 0x2bf   :  { %550 = vrot.lane.b32.xlu0 %v1666_v55, %s1498_s13 }
 0x2c1   :  { %1325 = vmatpush3.bf16.msra.mxu1 %v1322_v17  ;;  %v832_v17 = vld [vmem:[#allocation9 + $0x160] sm:$0xff] }
 0x2c2   :  { %1327 = vmatprep.subr.bf16.mxu1 %v1326_v20  ;;  %v1350_v19 = vpack.c.bf16 %v833_v18, %v832_v17 }
 0x329   :  { %v489_v21 = vpop.permute.xlu0 %488 }
 0x32a   :  { %v490_v22 = vadd.f32 %v489_v21, %v1654_v0  ;;  %v501_v0 = vlaneseq  ;;  %v835_v21 = vld [vmem:[#allocation9 + $0x178] sm:$0xff] }
 0x32c   :  { %v494_v23 = vmul.f32 0.001953125, %v490_v22  ;;  %v502_v39 = vshrl.u32 %v501_v0, 7 }
 0x32d   :  { %v492_v24 = vpop.permute.xlu1 %491  ;;  %v548_v25 = vpop.permute.xlu0 %547 }
 0x32e   :  { %v493_v29 = vadd.f32 %v492_v24, %v1658_v44  ;;  %v1673_v30 = vadd.f32 %v548_v25, %v1660_v46  ;;  %v496_v31 = vmul.f32 %v494_v23, %v494_v23  ;;  %v1685_v42 = vsub.s32 0, %v502_v39  ;;  %v447_v46 = vld [vmem:[%s1772_s3 + $0x1] sm:$0x1] }
 0x330   :  { %v495_v33 = vmul.f32 0.001953125, %v493_v29  ;;  %553 = vrot.lane.b32.xlu0 %v1673_v30, %s1495_s26 }
 0x331   :  { %v551_v34 = vpop.permute.xlu0 %550 }
 0x332   :  { %v497_v35 = vsub.f32 %v495_v33, %v496_v31  ;;  %v1678_v36 = vadd.f32 %v551_v34, %v1666_v55 }
 0x334   :  { %v498_v38 = vadd.f32 1e-05, %v497_v35  ;;  %556 = vrot.lane.b32.xlu0 %v1678_v36, %s1495_s26 }
 0x336   :  { %1393 = vrsqrt.f32 %v498_v38 }
 0x340   :  { %v1394_v43 = vpop.eup %1393 }
 0x341   :  { %v500_v44 = vmul.f32 %v1394_v43, %v446_v41 }
 0x343   :  { %v504_v47 = vrot.slane %v500_v44, %v1685_v42  ;;  %v509_v49 = vmul.f32 %v500_v44, %v494_v23 }
 0x345   :  { %v510_v50 = vsub.f32 %v447_v46, %v509_v49  ;;  %v505_v51 = vmul.f32 %v504_v47, %v1608_v26  ;;  %v506_v52 = vmul.f32 %v504_v47, %v1612_v28  ;;  %v507_v53 = vmul.f32 %v504_v47, %v1628_v37  ;;  %v822_v26 = vld [vmem:[#allocation9 + $0x110] sm:$0xff]  ;;  %v823_v28 = vld [vmem:[#allocation9 + $0x118] sm:$0xff] }
 0x346   :  { %v508_v54 = vmul.f32 %v504_v47, %v1638_v45  ;;  %v1330_v1 = vpack.c.bf16 %v823_v28, %v822_v26 }
 0x347   :  { %v514_v55 = vrot.slane %v510_v50, %v1685_v42 }
 0x349   :  { %v515_v56 = vadd.f32 %v514_v55, %v505_v51  ;;  %v516_v57 = vadd.f32 %v514_v55, %v506_v52  ;;  %v517_v58 = vadd.f32 %v514_v55, %v507_v53  ;;  %v518_v59 = vadd.f32 %v514_v55, %v508_v54 }
 0x34b   :  { %v519_v60 = vmax.f32 %v515_v56, 0.0  ;;  %v520_v61 = vmax.f32 %v516_v57, 0.0  ;;  %v521_v62 = vmax.f32 %v517_v58, 0.0  ;;  %v522_v63 = vmax.f32 %v518_v59, 0.0 }
 0x34d   :  { %600 = vst [vmem:[#allocation3 + $0x1] sm:$0xff] %v519_v60  ;;  %601 = vst [vmem:[#allocation3 + $0x9] sm:$0xff] %v520_v61  ;;  %1132 = vmatprep.mubr.f32.mxu0 %v519_v60 }
 0x34e   :  { %602 = vst [vmem:[#allocation3 + $0x19] sm:$0xff] %v521_v62  ;;  %603 = vst [vmem:[#allocation3 + $0x21] sm:$0xff] %v522_v63  ;;  %1133 = vmatmul.mubr.f32.vlgmr.msra.gmra.mrb[8].mxu0 %v520_v61 }
 0x34f   :  { %1135 = vmatprep.mubr.f32.mxu0 %v521_v62 }
 0x352   :  { %1136 = vmatmul.mubr.f32.gmra.mrb[10].mxu0 %v522_v63 }
 0x354   :  { %v604_v37 = vld [vmem:[#allocation3] sm:$0xff]  ;;  %v605_v45 = vld [vmem:[#allocation3 + $0x8] sm:$0xff] }
 0x355   :  { %1170 = vmatprep.mubr.f32.mxu1 %v604_v37  ;;  %v606_v4 = vld [vmem:[#allocation3 + $0x18] sm:$0xff]  ;;  %v607_v6 = vld [vmem:[#allocation3 + $0x20] sm:$0xff]  ;;  %v816_v23 = vld [vmem:[#allocation3 + $0xa] sm:$0xff] }
 0x356   :  { %1171 = vmatmul.mubr.f32.vlgmr.msra.gmra.mrb[0].mxu1 %v605_v45  ;;  %v815_v9 = vld [vmem:[#allocation3 + $0x2] sm:$0xff]  ;;  %v817_v24 = vld [vmem:[#allocation3 + $0x1a] sm:$0xff] }
 0x357   :  { %1329 = vmatpush3.bf16.msra.mxu1 %v1326_v20  ;;  %1173 = vmatprep.mubr.f32.mxu1 %v606_v4  ;;  %v834_v20 = vld [vmem:[#allocation9 + $0x170] sm:$0xff] }
 0x358   :  { %1331 = vmatprep.subr.bf16.mxu1 %v1330_v1  ;;  %v1354_v22 = vpack.c.bf16 %v835_v21, %v834_v20  ;;  %v818_v25 = vld [vmem:[#allocation3 + $0x22] sm:$0xff] }
 0x35a   :  { %1174 = vmatmul.mubr.f32.gmra.mrb[2].mxu1 %v607_v6 }
 0x35b   :  { %1333 = vmatpush3.bf16.msra.mxu1 %v1330_v1  ;;  %1208 = vmatprep.mubr.f32.mxu1 %v815_v9 }
 0x35c   :  { %1335 = vmatprep.subr.bf16.mxu1 %v1334_v5 }
 0x35f   :  { %1337 = vmatpush3.bf16.msra.mxu1 %v1334_v5 }
 0x360   :  { %1339 = vmatprep.subr.bf16.mxu1 %v1338_v10 }
 0x363   :  { %1341 = vmatpush3.bf16.msra.mxu1 %v1338_v10 }
 0x364   :  { %1343 = vmatprep.subr.bf16.mxu1 %v1342_v13 }
 0x367   :  { %1345 = vmatpush3.bf16.msra.mxu1 %v1342_v13 }
 0x368   :  { %1347 = vmatprep.subr.bf16.mxu1 %v1346_v16 }
 0x36b   :  { %1349 = vmatpush3.bf16.msra.mxu1 %v1346_v16 }
 0x36c   :  { %1351 = vmatprep.subr.bf16.mxu1 %v1350_v19 }
 0x36f   :  { %1353 = vmatpush3.bf16.msra.mxu1 %v1350_v19 }
 0x370   :  { %1355 = vmatprep.subr.bf16.mxu1 %v1354_v22 }
 0x373   :  { %1357 = vmatpush3.bf16.msra.mxu1 %v1354_v22 }
 0x376   :  { %1209 = vmatmul.mubr.f32.vlgmr.msra.gmra.mrb[0].mxu1 %v816_v23 }
 0x377   :  { %1211 = vmatprep.mubr.f32.mxu1 %v817_v24 }
 0x37a   :  { %1212 = vmatmul.mubr.f32.gmra.mrb[2].mxu1 %v818_v25 }
 0x3a2   :  { %v554_v29 = vpop.permute.xlu0 %553 }
 0x3a3   :  { %v555_v31 = vadd.f32 %v554_v29, %v1673_v30 }
 0x3a5   :  { %559 = vrot.lane.b32.xlu0 %v555_v31, %s1501_s2 }
 0x3a6   :  { %v557_v33 = vpop.permute.xlu0 %556 }
 0x3a7   :  { %v558_v34 = vadd.f32 %v557_v33, %v1678_v36 }
 0x3a9   :  { %562 = vrot.lane.b32.xlu0 %v558_v34, %s1501_s2 }
 0x417   :  { %v560_v35 = vpop.permute.xlu0 %559 }
 0x418   :  { %v561_v38 = vadd.f32 %v560_v35, %v555_v31 }
 0x41a   :  { %565 = vrot.lane.b32.xlu0 %v561_v38, %s1502_s28 }
 0x41b   :  { %v563_v0 = vpop.permute.xlu0 %562 }
 0x41c   :  { %v564_v39 = vadd.f32 %v563_v0, %v558_v34 }
 0x41e   :  { %568 = vrot.lane.b32.xlu0 %v564_v39, %s1502_s28 }
 0x421   :  { %v1134_v41 = vpop.f32.mrb[8].mxu0 }
 0x422   :  { %v711_v43 = vpop.f32.mrb[9].mxu0 }
 0x425   :  { %v1137_v44 = vpop.f32.mrb[10].mxu0 }
 0x426   :  { %v721_v46 = vpop.f32.mrb[11].mxu0 }
 0x449   :  { %v1210_v30 = vpop.f32.mrb[0].mxu1 }
 0x44a   :  { %v1702_v47 = vadd.f32 %v1210_v30, %v1134_v41  ;;  %v902_v49 = vpop.f32.mrb[1].mxu1 }
 0x44b   :  { %v1704_v50 = vadd.f32 %v902_v49, %v711_v43 }
 0x44c   :  { %v937_v36 = vmul.f32 %v1702_v47, %v1702_v47 }
 0x44d   :  { %v936_v51 = vmul.f32 %v1704_v50, %v1704_v50  ;;  %v1213_v52 = vpop.f32.mrb[2].mxu1  ;;  %v927_v55 = vadd.f32 %v1704_v50, %v1702_v47 }
 0x44e   :  { %v1710_v53 = vadd.f32 %v1213_v52, %v1137_v44  ;;  %v912_v54 = vpop.f32.mrb[3].mxu1 }
 0x44f   :  { %v1714_v56 = vadd.f32 %v912_v54, %v721_v46  ;;  %v940_v57 = vadd.f32 %v937_v36, %v936_v51  ;;  %v524_v54 = vld [vmem:[%s1772_s3 + $0x3] sm:$0x1] }
 0x450   :  { %v939_v60 = vmul.f32 %v1710_v53, %v1710_v53 }
 0x451   :  { %v928_v58 = vadd.f32 %v1714_v56, %v927_v55  ;;  %v938_v59 = vmul.f32 %v1714_v56, %v1714_v56  ;;  %v925_v55 = vld [vmem:[%s1772_s3 + $0x4] sm:$0x1] }
 0x453   :  { %v929_v61 = vadd.f32 %v1710_v53, %v928_v58  ;;  %v941_v62 = vadd.f32 %v940_v57, %v938_v59 }
 0x455   :  { %v930_v63 = vrot.slane %v929_v61, 4  ;;  %v942_v26 = vadd.f32 %v941_v62, %v939_v60 }
 0x457   :  { %v931_v28 = vadd.f32 %v930_v63, %v929_v61  ;;  %v943_v37 = vrot.slane %v942_v26, 4  ;;  %v926_v61 = vld [vmem:[%s1772_s3 + $0x5] sm:$0x1] }
 0x459   :  { %v932_v45 = vrot.slane %v931_v28, 2  ;;  %v944_v1 = vadd.f32 %v943_v37, %v942_v26 }
 0x45b   :  { %v933_v2 = vadd.f32 %v932_v45, %v931_v28  ;;  %v945_v3 = vrot.slane %v944_v1, 2 }
 0x45d   :  { %v934_v4 = vrot.slane %v933_v2, 1  ;;  %v946_v5 = vadd.f32 %v945_v3, %v944_v1 }
 0x45f   :  { %v935_v6 = vadd.f32 %v934_v4, %v933_v2  ;;  %v947_v7 = vrot.slane %v946_v5, 1 }
 0x461   :  { %949 = vrot.lane.b32.xlu1 %v935_v6, %s1498_s13  ;;  %v948_v8 = vadd.f32 %v947_v7, %v946_v5 }
 0x465   :  { %952 = vrot.lane.b32.xlu1 %v948_v8, %s1498_s13 }
 0x48c   :  { %v566_v21 = vpop.permute.xlu0 %565 }
 0x48d   :  { %v567_v23 = vadd.f32 %v566_v21, %v561_v38  ;;  %v523_v38 = vld [vmem:[%s1772_s3 + $0x2] sm:$0x1]  ;;  %s1503_s3 = smov [#allocation10]  }
 0x48e   :  { %s1015_s15 = sshll.u32 %s1503_s3, 4  ;;  %s1016_s15 = int_to_ptr.vmem [resolvable:$true] %s1015_s15 }
 0x48f   :  { %v571_v25 = vmul.f32 0.001953125, %v567_v23  ;;  %s1465_s16 = scalar_lea.vmem %s1016_s15, 512  ;;  %p1470_p11 = scmp.lt.s32.totalorder %s1016_s15, %s1016_s15 }
 0x490   :  { %v569_v22 = vpop.permute.xlu0 %568  ;;  %p1466_p10 = scmp.ne.s32.totalorder %s1016_s15, %s1465_s16  ;;  %p1471_p12 = scmp.lt.s32.totalorder %s1465_s16, %s1465_s16 }
 0x491   :  { %v570_v24 = vadd.f32 %v569_v22, %v564_v39  ;;  %v573_v31 = vmul.f32 %v571_v25, %v571_v25 }
 0x492   :  { %p1472_p13 = por %p1471_p12, %p1470_p11 }
 0x493   :  { %v572_v29 = vmul.f32 0.001953125, %v570_v24 }
 0x494   :  { %p1473_p0 = pnand %p1472_p13, %p1466_p10 }
 0x495   :  { %v574_v33 = vsub.f32 %v572_v29, %v573_v31 }
 0x497   :  { %v575_v34 = vadd.f32 1e-05, %v574_v33 }
 0x499   :  { %1395 = vrsqrt.f32 %v575_v34 }
 0x4a3   :  { %v1396_v51 = vpop.eup %1395 }
 0x4a4   :  { %v577_v39 = vmul.f32 %v1396_v51, %v523_v38 }
 0x4a6   :  { %v586_v52 = vmul.f32 %v577_v39, %v571_v25  ;;  %v581_v59 = vrot.slane %v577_v39, %v1685_v42 }
 0x4a8   :  { %v587_v58 = vsub.f32 %v524_v54, %v586_v52  ;;  %v582_v37 = vmul.f32 %v581_v59, %v1610_v27  ;;  %v583_v45 = vmul.f32 %v581_v59, %v1620_v32  ;;  %v584_v1 = vmul.f32 %v581_v59, %v1633_v40 }
 0x4a9   :  { %v585_v2 = vmul.f32 %v581_v59, %v1643_v48 }
 0x4aa   :  { %v591_v26 = vrot.slane %v587_v58, %v1685_v42 }
 0x4ac   :  { %v595_v27 = vadd.f32 %v591_v26, %v585_v2 }
 0x4d3   :  { %v950_v9 = vpop.permute.xlu1 %949 }
 0x4d4   :  { %v951_v10 = vadd.f32 %v950_v9, %v935_v6  ;;  %v593_v9 = vadd.f32 %v591_v26, %v583_v45 }
 0x4d6   :  { %955 = vrot.lane.b32.xlu1 %v951_v10, %s1495_s26 }
 0x4d7   :  { %v953_v11 = vpop.permute.xlu1 %952 }
 0x4d8   :  { %v954_v12 = vadd.f32 %v953_v11, %v948_v8  ;;  %v592_v8 = vadd.f32 %v591_v26, %v582_v37 }
 0x4da   :  { %958 = vrot.lane.b32.xlu1 %v954_v12, %s1495_s26 }
 0x548   :  { %v956_v13 = vpop.permute.xlu1 %955 }
 0x549   :  { %v957_v14 = vadd.f32 %v956_v13, %v951_v10  ;;  %v594_v10 = vadd.f32 %v591_v26, %v584_v1 }
 0x54b   :  { %961 = vrot.lane.b32.xlu1 %v957_v14, %s1501_s2 }
 0x54c   :  { %v959_v15 = vpop.permute.xlu1 %958 }
 0x54d   :  { %v960_v16 = vadd.f32 %v959_v15, %v954_v12 }
 0x54f   :  { %964 = vrot.lane.b32.xlu1 %v960_v16, %s1501_s2 }
 0x5bd   :  { %v962_v17 = vpop.permute.xlu1 %961 }
 0x5be   :  { %v963_v18 = vadd.f32 %v962_v17, %v957_v14 }
 0x5c0   :  { %967 = vrot.lane.b32.xlu1 %v963_v18, %s1502_s28 }
 0x5c1   :  { %v965_v19 = vpop.permute.xlu1 %964 }
 0x5c2   :  { %v966_v20 = vadd.f32 %v965_v19, %v960_v16 }
 0x5c4   :  { %970 = vrot.lane.b32.xlu1 %v966_v20, %s1502_s28 }
 0x632   :  { %v968_v35 = vpop.permute.xlu1 %967 }
 0x633   :  { %v969_v0 = vadd.f32 %v968_v35, %v963_v18 }
 0x635   :  { %v973_v41 = vmul.f32 0.001953125, %v969_v0 }
 0x636   :  { %v971_v43 = vpop.permute.xlu1 %970 }
 0x637   :  { %v972_v44 = vadd.f32 %v971_v43, %v966_v20  ;;  %v975_v46 = vmul.f32 %v973_v41, %v973_v41 }
 0x639   :  { %v974_v30 = vmul.f32 0.001953125, %v972_v44 }
 0x63b   :  { %v976_v49 = vsub.f32 %v974_v30, %v975_v46 }
 0x63d   :  { %v977_v36 = vadd.f32 1e-05, %v976_v49 }
 0x63f   :  { %1397 = vrsqrt.f32 %v977_v36 }
 0x649   :  { %v1398_v57 = vpop.eup %1397 }
 0x64a   :  { %v979_v60 = vmul.f32 %v1398_v57, %v925_v55 }
 0x64c   :  { %v983_v62 = vrot.slane %v979_v60, %v1685_v42  ;;  %v988_v63 = vmul.f32 %v979_v60, %v973_v41 }
 0x64e   :  { %v989_v28 = vsub.f32 %v926_v61, %v988_v63  ;;  %v984_v3 = vmul.f32 %v1704_v50, %v983_v62  ;;  %v985_v4 = vmul.f32 %v1702_v47, %v983_v62  ;;  %v986_v5 = vmul.f32 %v1714_v56, %v983_v62 }
 0x64f   :  { %v987_v6 = vmul.f32 %v1710_v53, %v983_v62 }
 0x650   :  { %v993_v7 = vrot.slane %v989_v28, %v1685_v42 }
 0x652   :  { %v994_v11 = vadd.f32 %v993_v7, %v984_v3  ;;  %v995_v32 = vadd.f32 %v993_v7, %v985_v4  ;;  %v996_v12 = vadd.f32 %v993_v7, %v986_v5  ;;  %v997_v40 = vadd.f32 %v993_v7, %v987_v6 }
 0x654   :  { %v998_v48 = vadd.f32 %v994_v11, %v592_v8  ;;  %v999_v50 = vadd.f32 %v995_v32, %v593_v9  ;;  %v1000_v13 = vadd.f32 %v996_v12, %v594_v10  ;;  %v1001_v47 = vadd.f32 %v997_v40, %v595_v27 }
 0x656   :  { %v1002_v14 = vmax.f32 %v998_v48, 0.0  ;;  %v1003_v56 = vmax.f32 %v999_v50, 0.0  ;;  %v1004_v15 = vmax.f32 %v1000_v13, 0.0  ;;  %v1005_v53 = vmax.f32 %v1001_v47, 0.0 }
 0x658   :  { %1006 = vst [vmem:[#allocation10] sm:$0xff] %v1002_v14  ;;  %1007 = vst [vmem:[#allocation10 + $0x8] sm:$0xff] %v1003_v56 }
 0x659   :  { %1008 = vst [vmem:[#allocation10 + $0x10] sm:$0xff] %v1004_v15  ;;  %1009 = vst [vmem:[#allocation10 + $0x18] sm:$0xff] %v1005_v53 }
 0x65a   :  { %1476 = shalt.err (!%p1473_p0)
}
 0x65b   :  { %s1477_s19 = scalar_lea.hbm %s1773_s4, 512 }
 0x65c   :  { %p1478_p1 = scmp.ne.s32.totalorder %s1773_s4, %s1477_s19  ;;  %p1481_p2 = scmp.lt.u32.totalorder %s1477_s19, %s1773_s4 }
 0x65e   :  { %p1483_p3 = pnand %p1481_p2, %p1478_p1 }
 0x660   :  { %1486 = shalt.err (!%p1483_p3)
}
 0x661   :  { %1021 = dma.vmem_to_hbm [thread:$0]  %s1016_s15, 512, %s1773_s4, [#allocation6], %s1497_s1, %s1497_s1, %s1498_s13  }
 0x662   :  { %1491 = dma.done.wait [#allocation6], 512  }
 0x663   :  { %1492 = vsyncadd [#allocation6], 4294966784 }
 0x664   :  { %1025 = vsyncpa [#allocation5], 1 }
 0x665   :  { %1026 = vsyncpa [#allocation8], 1 }
 0x666   :  { %1027 = vsyncpa [#allocation6], 1 }

</bundles_post_ra>
